<compile_context>
chip_gen: v7x
topology: tpu7x:2x2x1
jax: 0.10.0
libtpu: 0.0.40
codegen_flags: <defaults>
</compile_context>

<pallas_src>
import functools

import jax
import jax.numpy as jnp
from jax import lax
from jax.experimental import pallas as pl
from jax.experimental.pallas import tpu as pltpu  # noqa: F401  (not needed for this tiny layer)

D_MODEL = 32
NHEAD = 4
DIM_FEEDFORWARD = 128
SEQ_LEN = 8
BATCH = 2


def _decoder_layer_kernel(x_ref, wqkv_ref, bqkv_ref, wf_ref, bf_ref,
                          w2_ref, b2_ref, o_ref, *, seq_len, batch, nhead, d_model):
    rows = seq_len * batch                 # flattened (l, n) rows
    dh = d_model // nhead

    x = x_ref[...]                         # [L*N, E]        (hoisted loads, values in registers)
    wqkv = wqkv_ref[...]                   # [E, 3E]  (q-scale pre-folded)
    bqkv = bqkv_ref[...]                   # [1, 3E]
    wf = wf_ref[...]                       # [E, FF]  (wo @ w1 pre-folded)
    bf = bf_ref[...]                       # [1, FF]  (bo @ w1 + b1 pre-folded)
    w2 = w2_ref[...]                       # [FF, E]
    b2 = b2_ref[...]                       # [1, E]

    # Fused QKV projection over all (l, n) rows at once: one MXU matmul for all heads/batches.
    qkv = jnp.dot(x, wqkv, preferred_element_type=jnp.float32) + bqkv      # [L*N, 3E]

    # Rows are interleaved as (l, n); instead of strided/reshaped per-batch extraction
    # (XLU shuffles / extra grid steps), mask out cross-batch score pairs additively.
    row_b = lax.broadcasted_iota(jnp.int32, (rows, rows), 0) % batch
    col_b = lax.broadcasted_iota(jnp.int32, (rows, rows), 1) % batch
    neg_mask = jnp.where(row_b == col_b, 0.0, -1e30).astype(jnp.float32)   # [L*N, L*N]

    hidden = None
    for h in range(nhead):                 # tiny static head count -> unrolled, all in registers
        lo = h * dh
        qh = qkv[:, lo:lo + dh]                                            # [L*N, dh]
        kh = qkv[:, d_model + lo:d_model + lo + dh]
        vh = qkv[:, 2 * d_model + lo:2 * d_model + lo + dh]

        # scores (q already scaled via folded weights) with cross-batch pairs masked off
        s = lax.dot_general(qh, kh, (((1,), (1,)), ((), ())),
                            preferred_element_type=jnp.float32) + neg_mask  # [L*N, L*N]
        m = jnp.max(s, axis=-1, keepdims=True)
        p = jnp.exp(s - m)                                                  # masked entries -> 0
        denom = jnp.sum(p, axis=-1, keepdims=True)
        alpha = p * pl.reciprocal(denom, approx=True)                       # EUP reciprocal
        oh = jnp.dot(alpha, vh, preferred_element_type=jnp.float32)         # [L*N, dh]

        # Fold the head-concat into the (already wo-fused) linear1 weight: per-head sublane
        # slice of wf, accumulated -- avoids a lane concat entirely.
        part = jnp.dot(oh, wf[lo:lo + dh, :], preferred_element_type=jnp.float32)
        hidden = part if hidden is None else hidden + part                  # [L*N, FF]

    h1 = jnp.maximum(hidden + bf, 0.0)                                      # linear1 + ReLU
    y = jnp.maximum(jnp.dot(h1, w2, preferred_element_type=jnp.float32) + b2, 0.0)  # linear2 + ReLU
    o_ref[...] = y                                                          # single dense store


def transformer_decoder_layer1(src, params, *, nhead=NHEAD):
    """src: [L, N, E] (seq, batch, d_model), nn.MultiheadAttention's default layout."""
    L, N, E = src.shape
    dh = E // nhead
    scale = 1.0 / float(dh) ** 0.5

    # Fold the softmax 1/sqrt(dh) scale into the q slice of the packed QKV weight/bias.
    q_scale = jnp.concatenate([jnp.full((E,), scale, jnp.float32),
                               jnp.ones((2 * E,), jnp.float32)])
    wqkv = params["wqkv"] * q_scale[None, :]
    bqkv = params["bqkv"] * q_scale[None, :]

    # Fold the attention out-projection into linear1 (no residual / norm / activation between).
    wf = params["wo"] @ params["w1"]                        # [E, FF]
    bf = params["bo"] @ params["w1"] + params["b1"]         # [1, FF]

    # Contiguous reshape (bitcast) -- no transpose, no extra HBM round trip.
    x2 = src.astype(jnp.float32).reshape(L * N, E)

    kernel = functools.partial(_decoder_layer_kernel, seq_len=L, batch=N,
                               nhead=nhead, d_model=E)
    out = pl.pallas_call(
        kernel,
        out_shape=jax.ShapeDtypeStruct((L * N, E), jnp.float32),
    )(x2, wqkv, bqkv, wf, bf, params["w2"], params["b2"])
    return out.reshape(L, N, E)


# ----- deterministic parameter init (shapes follow __init__; weights stored pre-transposed) ---
def init_params(key, d_model=D_MODEL, dim_feedforward=DIM_FEEDFORWARD):
    ks = jax.random.split(key, 8)

    def uni(k, shape, fan_in):
        lim = 1.0 / fan_in ** 0.5
        return jax.random.uniform(k, shape, jnp.float32, -lim, lim)

    p = {}
    # MultiheadAttention in_proj (packed q|k|v) and out_proj
    p["wqkv"] = uni(ks[0], (d_model, 3 * d_model), d_model)
    p["bqkv"] = uni(ks[1], (1, 3 * d_model), d_model)
    p["wo"] = uni(ks[2], (d_model, d_model), d_model)
    p["bo"] = uni(ks[3], (1, d_model), d_model)
    # linear1 / linear2
    p["w1"] = uni(ks[4], (d_model, dim_feedforward), d_model)
    p["b1"] = uni(ks[5], (1, dim_feedforward), d_model)
    p["w2"] = uni(ks[6], (dim_feedforward, d_model), dim_feedforward)
    p["b2"] = uni(ks[7], (1, d_model), dim_feedforward)
    return p


# ----- pure-JAX reference (unfused, mirrors the PyTorch module) -------------------------------
def reference_forward(src, params, *, nhead=NHEAD):
    L, N, E = src.shape
    dh = E // nhead
    qkv = src @ params["wqkv"] + params["bqkv"]               # [L, N, 3E]
    q, k, v = jnp.split(qkv, 3, axis=-1)
    q = q * (1.0 / dh ** 0.5)

    def heads(t):                                             # [L, N, E] -> [N, H, L, dh]
        return t.reshape(L, N, nhead, dh).transpose(1, 2, 0, 3)

    qh, kh, vh = heads(q), heads(k), heads(v)
    s = jnp.einsum("nhld,nhmd->nhlm", qh, kh)
    a = jax.nn.softmax(s, axis=-1)
    o = jnp.einsum("nhlm,nhmd->nhld", a, vh)                  # [N, H, L, dh]
    o = o.transpose(2, 0, 1, 3).reshape(L, N, E)
    o = o @ params["wo"] + params["bo"]
    h1 = jnp.maximum(o @ params["w1"] + params["b1"], 0.0)
    return jnp.maximum(h1 @ params["w2"] + params["b2"], 0.0)


if __name__ == "__main__":
    key = jax.random.PRNGKey(0)
    k_src, k_par = jax.random.split(key)

    # module forward: attention-weight output of MHA is discarded -> not computed in the kernel
    src = jax.random.normal(k_src, (SEQ_LEN, BATCH, D_MODEL), jnp.float32)
    params = init_params(k_par)

    out = transformer_decoder_layer1(src, params)
    out = jax.block_until_ready(out)

    ref = reference_forward(src, params)
    assert out.shape == (SEQ_LEN, BATCH, D_MODEL)
    max_diff = float(jnp.max(jnp.abs(out - ref)))
    assert jnp.allclose(out, ref, rtol=1e-2, atol=1e-2), max_diff

    print("KERNEL_OK")
</pallas_src>

<mosaic_0001>
module attributes {stable_mosaic.version = 11 : i64} {
  func.func @_decoder_layer_kernel(%arg0: memref<16x32xf32, #tpu.memory_space<vmem>>, %arg1: memref<32x96xf32, #tpu.memory_space<vmem>>, %arg2: memref<1x96xf32, #tpu.memory_space<vmem>>, %arg3: memref<32x128xf32, #tpu.memory_space<vmem>>, %arg4: memref<1x128xf32, #tpu.memory_space<vmem>>, %arg5: memref<128x32xf32, #tpu.memory_space<vmem>>, %arg6: memref<1x32xf32, #tpu.memory_space<vmem>>, %arg7: memref<16x32xf32, #tpu.memory_space<vmem>>) attributes {dimension_semantics = [], scalar_prefetch = 0 : i64, scratch_operands = 0 : i64, tpu.core_type = #tpu.core_type<tc>} {
    %c0 = arith.constant 0 : index
    %c0_0 = arith.constant 0 : index
    %0 = vector.load %arg0[%c0, %c0_0] : memref<16x32xf32, #tpu.memory_space<vmem>>, vector<16x32xf32>
    %c0_1 = arith.constant 0 : index
    %c0_2 = arith.constant 0 : index
    %1 = vector.load %arg1[%c0_1, %c0_2] : memref<32x96xf32, #tpu.memory_space<vmem>>, vector<32x96xf32>
    %c0_3 = arith.constant 0 : index
    %c0_4 = arith.constant 0 : index
    %2 = vector.load %arg2[%c0_3, %c0_4] : memref<1x96xf32, #tpu.memory_space<vmem>>, vector<1x96xf32>
    %c0_5 = arith.constant 0 : index
    %c0_6 = arith.constant 0 : index
    %3 = vector.load %arg3[%c0_5, %c0_6] : memref<32x128xf32, #tpu.memory_space<vmem>>, vector<32x128xf32>
    %c0_7 = arith.constant 0 : index
    %c0_8 = arith.constant 0 : index
    %4 = vector.load %arg4[%c0_7, %c0_8] : memref<1x128xf32, #tpu.memory_space<vmem>>, vector<1x128xf32>
    %c0_9 = arith.constant 0 : index
    %c0_10 = arith.constant 0 : index
    %5 = vector.load %arg5[%c0_9, %c0_10] : memref<128x32xf32, #tpu.memory_space<vmem>>, vector<128x32xf32>
    %c0_11 = arith.constant 0 : index
    %c0_12 = arith.constant 0 : index
    %6 = vector.load %arg6[%c0_11, %c0_12] : memref<1x32xf32, #tpu.memory_space<vmem>>, vector<1x32xf32>
    %cst = arith.constant dense<0.000000e+00> : vector<16x96xf32>
    %7 = tpu.matmul %0, %1, %cst {dimension_numbers = #tpu.dot_dimension_numbers<[1], [0], [0], [1], [0, 0, 1, 1], [], []>} : vector<16x32xf32>, vector<32x96xf32>, vector<16x96xf32> -> vector<16x96xf32>
    %8 = vector.broadcast %2 : vector<1x96xf32> to vector<16x96xf32>
    %9 = arith.addf %7, %8 : vector<16x96xf32>
    %10 = tpu.iota {dimensions = array<i32: 0>} : vector<16x16xi32>
    %c2_i32 = arith.constant 2 : i32
    %c0_i32 = arith.constant 0 : i32
    %11 = arith.cmpi eq, %c2_i32, %c0_i32 : i32
    %c1_i32 = arith.constant 1 : i32
    %12 = arith.select %11, %c1_i32, %c2_i32 : i32
    %13 = vector.broadcast %12 : i32 to vector<16x16xi32>
    %14 = arith.remsi %10, %13 : vector<16x16xi32>
    %c0_i32_13 = arith.constant 0 : i32
    %15 = vector.broadcast %c0_i32_13 : i32 to vector<16x16xi32>
    %16 = arith.cmpi ne, %14, %15 : vector<16x16xi32>
    %c0_i32_14 = arith.constant 0 : i32
    %17 = vector.broadcast %c0_i32_14 : i32 to vector<16x16xi32>
    %18 = arith.cmpi slt, %14, %17 : vector<16x16xi32>
    %c0_i32_15 = arith.constant 0 : i32
    %19 = arith.cmpi slt, %12, %c0_i32_15 : i32
    %20 = vector.broadcast %19 : i1 to vector<16x16xi1>
    %21 = vector.broadcast %20 : vector<16x16xi1> to vector<16x16xi1>
    %22 = arith.xori %18, %21 : vector<16x16xi1>
    %23 = arith.andi %22, %16 : vector<16x16xi1>
    %24 = vector.broadcast %12 : i32 to vector<16x16xi32>
    %25 = arith.addi %14, %24 : vector<16x16xi32>
    %26 = arith.select %23, %25, %14 : vector<16x16xi1>, vector<16x16xi32>
    %27 = tpu.iota {dimensions = array<i32: 1>} : vector<16x16xi32>
    %c2_i32_16 = arith.constant 2 : i32
    %c0_i32_17 = arith.constant 0 : i32
    %28 = arith.cmpi eq, %c2_i32_16, %c0_i32_17 : i32
    %c1_i32_18 = arith.constant 1 : i32
    %29 = arith.select %28, %c1_i32_18, %c2_i32_16 : i32
    %30 = vector.broadcast %29 : i32 to vector<16x16xi32>
    %31 = arith.remsi %27, %30 : vector<16x16xi32>
    %c0_i32_19 = arith.constant 0 : i32
    %32 = vector.broadcast %c0_i32_19 : i32 to vector<16x16xi32>
    %33 = arith.cmpi ne, %31, %32 : vector<16x16xi32>
    %c0_i32_20 = arith.constant 0 : i32
    %34 = vector.broadcast %c0_i32_20 : i32 to vector<16x16xi32>
    %35 = arith.cmpi slt, %31, %34 : vector<16x16xi32>
    %c0_i32_21 = arith.constant 0 : i32
    %36 = arith.cmpi slt, %29, %c0_i32_21 : i32
    %37 = vector.broadcast %36 : i1 to vector<16x16xi1>
    %38 = vector.broadcast %37 : vector<16x16xi1> to vector<16x16xi1>
    %39 = arith.xori %35, %38 : vector<16x16xi1>
    %40 = arith.andi %39, %33 : vector<16x16xi1>
    %41 = vector.broadcast %29 : i32 to vector<16x16xi32>
    %42 = arith.addi %31, %41 : vector<16x16xi32>
    %43 = arith.select %40, %42, %31 : vector<16x16xi1>, vector<16x16xi32>
    %44 = arith.cmpi eq, %26, %43 : vector<16x16xi32>
    %cst_22 = arith.constant 0.000000e+00 : f32
    %cst_23 = arith.constant -1.000000e+30 : f32
    %45 = vector.broadcast %cst_22 : f32 to vector<16x16xf32>
    %46 = vector.broadcast %cst_23 : f32 to vector<16x16xf32>
    %47 = arith.select %44, %45, %46 : vector<16x16xi1>, vector<16x16xf32>
    %48 = vector.extract_strided_slice %9 {offsets = [0, 0], sizes = [16, 8], strides = [1, 1]} : vector<16x96xf32> to vector<16x8xf32>
    %49 = vector.extract_strided_slice %9 {offsets = [0, 32], sizes = [16, 8], strides = [1, 1]} : vector<16x96xf32> to vector<16x8xf32>
    %50 = vector.extract_strided_slice %9 {offsets = [0, 64], sizes = [16, 8], strides = [1, 1]} : vector<16x96xf32> to vector<16x8xf32>
    %cst_24 = arith.constant dense<0.000000e+00> : vector<16x16xf32>
    %51 = tpu.matmul %48, %49, %cst_24 {dimension_numbers = #tpu.dot_dimension_numbers<[1], [1], [0], [0], [0, 0, 1, 0], [], []>} : vector<16x8xf32>, vector<16x8xf32>, vector<16x16xf32> -> vector<16x16xf32>
    %52 = arith.addf %51, %47 : vector<16x16xf32>
    %cst_25 = arith.constant dense<0xFF800000> : vector<16xf32>
    %53 = vector.multi_reduction <maximumf>, %52, %cst_25 [1] : vector<16x16xf32> to vector<16xf32>
    %54 = vector.shape_cast %53 : vector<16xf32> to vector<16x1xf32>
    %55 = vector.broadcast %54 : vector<16x1xf32> to vector<16x16xf32>
    %56 = arith.subf %52, %55 : vector<16x16xf32>
    %57 = math.exp %56 : vector<16x16xf32>
    %cst_26 = arith.constant dense<0.000000e+00> : vector<16xf32>
    %58 = vector.multi_reduction <add>, %57, %cst_26 [1] : vector<16x16xf32> to vector<16xf32>
    %59 = vector.shape_cast %58 : vector<16xf32> to vector<16x1xf32>
    %60 = tpu.reciprocal %59 {approx = true} : vector<16x1xf32> -> vector<16x1xf32>
    %61 = vector.broadcast %60 : vector<16x1xf32> to vector<16x16xf32>
    %62 = arith.mulf %57, %61 : vector<16x16xf32>
    %cst_27 = arith.constant dense<0.000000e+00> : vector<16x8xf32>
    %63 = tpu.matmul %62, %50, %cst_27 {dimension_numbers = #tpu.dot_dimension_numbers<[1], [0], [0], [1], [0, 0, 1, 1], [], []>} : vector<16x16xf32>, vector<16x8xf32>, vector<16x8xf32> -> vector<16x8xf32>
    %64 = vector.extract_strided_slice %3 {offsets = [0, 0], sizes = [8, 128], strides = [1, 1]} : vector<32x128xf32> to vector<8x128xf32>
    %cst_28 = arith.constant dense<0.000000e+00> : vector<16x128xf32>
    %65 = tpu.matmul %63, %64, %cst_28 {dimension_numbers = #tpu.dot_dimension_numbers<[1], [0], [0], [1], [0, 0, 1, 1], [], []>} : vector<16x8xf32>, vector<8x128xf32>, vector<16x128xf32> -> vector<16x128xf32>
    %66 = vector.extract_strided_slice %9 {offsets = [0, 8], sizes = [16, 8], strides = [1, 1]} : vector<16x96xf32> to vector<16x8xf32>
    %67 = vector.extract_strided_slice %9 {offsets = [0, 40], sizes = [16, 8], strides = [1, 1]} : vector<16x96xf32> to vector<16x8xf32>
    %68 = vector.extract_strided_slice %9 {offsets = [0, 72], sizes = [16, 8], strides = [1, 1]} : vector<16x96xf32> to vector<16x8xf32>
    %cst_29 = arith.constant dense<0.000000e+00> : vector<16x16xf32>
    %69 = tpu.matmul %66, %67, %cst_29 {dimension_numbers = #tpu.dot_dimension_numbers<[1], [1], [0], [0], [0, 0, 1, 0], [], []>} : vector<16x8xf32>, vector<16x8xf32>, vector<16x16xf32> -> vector<16x16xf32>
    %70 = arith.addf %69, %47 : vector<16x16xf32>
    %cst_30 = arith.constant dense<0xFF800000> : vector<16xf32>
    %71 = vector.multi_reduction <maximumf>, %70, %cst_30 [1] : vector<16x16xf32> to vector<16xf32>
    %72 = vector.shape_cast %71 : vector<16xf32> to vector<16x1xf32>
    %73 = vector.broadcast %72 : vector<16x1xf32> to vector<16x16xf32>
    %74 = arith.subf %70, %73 : vector<16x16xf32>
    %75 = math.exp %74 : vector<16x16xf32>
    %cst_31 = arith.constant dense<0.000000e+00> : vector<16xf32>
    %76 = vector.multi_reduction <add>, %75, %cst_31 [1] : vector<16x16xf32> to vector<16xf32>
    %77 = vector.shape_cast %76 : vector<16xf32> to vector<16x1xf32>
    %78 = tpu.reciprocal %77 {approx = true} : vector<16x1xf32> -> vector<16x1xf32>
    %79 = vector.broadcast %78 : vector<16x1xf32> to vector<16x16xf32>
    %80 = arith.mulf %75, %79 : vector<16x16xf32>
    %cst_32 = arith.constant dense<0.000000e+00> : vector<16x8xf32>
    %81 = tpu.matmul %80, %68, %cst_32 {dimension_numbers = #tpu.dot_dimension_numbers<[1], [0], [0], [1], [0, 0, 1, 1], [], []>} : vector<16x16xf32>, vector<16x8xf32>, vector<16x8xf32> -> vector<16x8xf32>
    %82 = vector.extract_strided_slice %3 {offsets = [8, 0], sizes = [8, 128], strides = [1, 1]} : vector<32x128xf32> to vector<8x128xf32>
    %cst_33 = arith.constant dense<0.000000e+00> : vector<16x128xf32>
    %83 = tpu.matmul %81, %82, %cst_33 {dimension_numbers = #tpu.dot_dimension_numbers<[1], [0], [0], [1], [0, 0, 1, 1], [], []>} : vector<16x8xf32>, vector<8x128xf32>, vector<16x128xf32> -> vector<16x128xf32>
    %84 = arith.addf %65, %83 : vector<16x128xf32>
    %85 = vector.extract_strided_slice %9 {offsets = [0, 16], sizes = [16, 8], strides = [1, 1]} : vector<16x96xf32> to vector<16x8xf32>
    %86 = vector.extract_strided_slice %9 {offsets = [0, 48], sizes = [16, 8], strides = [1, 1]} : vector<16x96xf32> to vector<16x8xf32>
    %87 = vector.extract_strided_slice %9 {offsets = [0, 80], sizes = [16, 8], strides = [1, 1]} : vector<16x96xf32> to vector<16x8xf32>
    %cst_34 = arith.constant dense<0.000000e+00> : vector<16x16xf32>
    %88 = tpu.matmul %85, %86, %cst_34 {dimension_numbers = #tpu.dot_dimension_numbers<[1], [1], [0], [0], [0, 0, 1, 0], [], []>} : vector<16x8xf32>, vector<16x8xf32>, vector<16x16xf32> -> vector<16x16xf32>
    %89 = arith.addf %88, %47 : vector<16x16xf32>
    %cst_35 = arith.constant dense<0xFF800000> : vector<16xf32>
    %90 = vector.multi_reduction <maximumf>, %89, %cst_35 [1] : vector<16x16xf32> to vector<16xf32>
    %91 = vector.shape_cast %90 : vector<16xf32> to vector<16x1xf32>
    %92 = vector.broadcast %91 : vector<16x1xf32> to vector<16x16xf32>
    %93 = arith.subf %89, %92 : vector<16x16xf32>
    %94 = math.exp %93 : vector<16x16xf32>
    %cst_36 = arith.constant dense<0.000000e+00> : vector<16xf32>
    %95 = vector.multi_reduction <add>, %94, %cst_36 [1] : vector<16x16xf32> to vector<16xf32>
    %96 = vector.shape_cast %95 : vector<16xf32> to vector<16x1xf32>
    %97 = tpu.reciprocal %96 {approx = true} : vector<16x1xf32> -> vector<16x1xf32>
    %98 = vector.broadcast %97 : vector<16x1xf32> to vector<16x16xf32>
    %99 = arith.mulf %94, %98 : vector<16x16xf32>
    %cst_37 = arith.constant dense<0.000000e+00> : vector<16x8xf32>
    %100 = tpu.matmul %99, %87, %cst_37 {dimension_numbers = #tpu.dot_dimension_numbers<[1], [0], [0], [1], [0, 0, 1, 1], [], []>} : vector<16x16xf32>, vector<16x8xf32>, vector<16x8xf32> -> vector<16x8xf32>
    %101 = vector.extract_strided_slice %3 {offsets = [16, 0], sizes = [8, 128], strides = [1, 1]} : vector<32x128xf32> to vector<8x128xf32>
    %cst_38 = arith.constant dense<0.000000e+00> : vector<16x128xf32>
    %102 = tpu.matmul %100, %101, %cst_38 {dimension_numbers = #tpu.dot_dimension_numbers<[1], [0], [0], [1], [0, 0, 1, 1], [], []>} : vector<16x8xf32>, vector<8x128xf32>, vector<16x128xf32> -> vector<16x128xf32>
    %103 = arith.addf %84, %102 : vector<16x128xf32>
    %104 = vector.extract_strided_slice %9 {offsets = [0, 24], sizes = [16, 8], strides = [1, 1]} : vector<16x96xf32> to vector<16x8xf32>
    %105 = vector.extract_strided_slice %9 {offsets = [0, 56], sizes = [16, 8], strides = [1, 1]} : vector<16x96xf32> to vector<16x8xf32>
    %106 = vector.extract_strided_slice %9 {offsets = [0, 88], sizes = [16, 8], strides = [1, 1]} : vector<16x96xf32> to vector<16x8xf32>
    %cst_39 = arith.constant dense<0.000000e+00> : vector<16x16xf32>
    %107 = tpu.matmul %104, %105, %cst_39 {dimension_numbers = #tpu.dot_dimension_numbers<[1], [1], [0], [0], [0, 0, 1, 0], [], []>} : vector<16x8xf32>, vector<16x8xf32>, vector<16x16xf32> -> vector<16x16xf32>
    %108 = arith.addf %107, %47 : vector<16x16xf32>
    %cst_40 = arith.constant dense<0xFF800000> : vector<16xf32>
    %109 = vector.multi_reduction <maximumf>, %108, %cst_40 [1] : vector<16x16xf32> to vector<16xf32>
    %110 = vector.shape_cast %109 : vector<16xf32> to vector<16x1xf32>
    %111 = vector.broadcast %110 : vector<16x1xf32> to vector<16x16xf32>
    %112 = arith.subf %108, %111 : vector<16x16xf32>
    %113 = math.exp %112 : vector<16x16xf32>
    %cst_41 = arith.constant dense<0.000000e+00> : vector<16xf32>
    %114 = vector.multi_reduction <add>, %113, %cst_41 [1] : vector<16x16xf32> to vector<16xf32>
    %115 = vector.shape_cast %114 : vector<16xf32> to vector<16x1xf32>
    %116 = tpu.reciprocal %115 {approx = true} : vector<16x1xf32> -> vector<16x1xf32>
    %117 = vector.broadcast %116 : vector<16x1xf32> to vector<16x16xf32>
    %118 = arith.mulf %113, %117 : vector<16x16xf32>
    %cst_42 = arith.constant dense<0.000000e+00> : vector<16x8xf32>
    %119 = tpu.matmul %118, %106, %cst_42 {dimension_numbers = #tpu.dot_dimension_numbers<[1], [0], [0], [1], [0, 0, 1, 1], [], []>} : vector<16x16xf32>, vector<16x8xf32>, vector<16x8xf32> -> vector<16x8xf32>
    %120 = vector.extract_strided_slice %3 {offsets = [24, 0], sizes = [8, 128], strides = [1, 1]} : vector<32x128xf32> to vector<8x128xf32>
    %cst_43 = arith.constant dense<0.000000e+00> : vector<16x128xf32>
    %121 = tpu.matmul %119, %120, %cst_43 {dimension_numbers = #tpu.dot_dimension_numbers<[1], [0], [0], [1], [0, 0, 1, 1], [], []>} : vector<16x8xf32>, vector<8x128xf32>, vector<16x128xf32> -> vector<16x128xf32>
    %122 = arith.addf %103, %121 : vector<16x128xf32>
    %123 = vector.broadcast %4 : vector<1x128xf32> to vector<16x128xf32>
    %124 = arith.addf %122, %123 : vector<16x128xf32>
    %cst_44 = arith.constant 0.000000e+00 : f32
    %125 = vector.broadcast %cst_44 : f32 to vector<16x128xf32>
    %126 = arith.maximumf %124, %125 : vector<16x128xf32>
    %cst_45 = arith.constant dense<0.000000e+00> : vector<16x32xf32>
    %127 = tpu.matmul %126, %5, %cst_45 {dimension_numbers = #tpu.dot_dimension_numbers<[1], [0], [0], [1], [0, 0, 1, 1], [], []>} : vector<16x128xf32>, vector<128x32xf32>, vector<16x32xf32> -> vector<16x32xf32>
    %128 = vector.broadcast %6 : vector<1x32xf32> to vector<16x32xf32>
    %129 = arith.addf %127, %128 : vector<16x32xf32>
    %cst_46 = arith.constant 0.000000e+00 : f32
    %130 = vector.broadcast %cst_46 : f32 to vector<16x32xf32>
    %131 = arith.maximumf %129, %130 : vector<16x32xf32>
    %c0_47 = arith.constant 0 : index
    %c0_48 = arith.constant 0 : index
    %132 = vector.load %arg7[%c0_47, %c0_48] : memref<16x32xf32, #tpu.memory_space<vmem>>, vector<16x32xf32>
    tpu.vector_store %arg7[%c0_47, %c0_48], %131 {strides = array<i32>} : memref<16x32xf32, #tpu.memory_space<vmem>>, vector<16x32xf32>,
    return
  }
}

</mosaic_0001>

<bundles_post_ra>
// kernel: tpu_custom_call.1
= control target key start
LH: loop header
LB: loop body
LE: loop exit
PB: predicated region body
PF: predicated region fallthrough
CT: control target
= control target key end

     0   :  { %vm62_vm0 = vcmask 261120   ;;  %s2108_s0 = inlined_call_operand.vmem [shape: f32[16,32], index: 0, kind: input, shape index: {}]   ;;  %s2109_s1 = inlined_call_operand.vmem [shape: f32[32,96], index: 1, kind: input, shape index: {}]   ;;  %s2110_s2 = inlined_call_operand.vmem [shape: f32[1,96], index: 2, kind: input, shape index: {}]   ;;  %s2111_s3 = inlined_call_operand.vmem [shape: f32[32,128], index: 3, kind: input, shape index: {}]   ;;  %s2112_s4 = inlined_call_operand.vmem [shape: f32[1,128], index: 4, kind: input, shape index: {}]   ;;  %s2113_s5 = inlined_call_operand.vmem [shape: f32[128,32], index: 5, kind: input, shape index: {}]   ;;  %s2114_s6 = inlined_call_operand.vmem [shape: f32[1,32], index: 6, kind: input, shape index: {}]   ;;  %s2115_s7 = inlined_call_operand.hbm [shape: f32[16,32], index: 7, kind: output, shape index: {}]  }
   0x1   :  { %v29_v0 = vld [vmem:[%s2109_s1] sm:$0xff]  ;;  %v30_v1 = vld [vmem:[%s2109_s1 + $0x8] sm:$0xff]  ;;  %v31_v2 = vld [vmem:[%s2109_s1 + $0x10] sm:$0xff] }
   0x2   :  { %v1655_v3 = vpack.c.bf16 %v30_v1, %v29_v0  ;;  %v32_v4 = vld [vmem:[%s2109_s1 + $0x18] sm:$0xff]  ;;  %v27_v5 = vld [vmem:[%s2108_s0] sm:$0xff] }
   0x3   :  { %v1659_v6 = vpack.c.bf16 %v32_v4, %v31_v2  ;;  %1541 = vmatprep.mubr.msk.f32.mxu0 %vm62_vm0, %v27_v5 }
   0x4   :  { %12 = vsyncpa [#allocation3], 0  ;;  %1656 = vmatprep.subr.bf16.mxu0 %v1655_v3  ;;  %v28_v7 = vld [vmem:[%s2108_s0 + $0x8] sm:$0xff]  ;;  %v1428_v8 = vld [vmem:[%s2110_s2] ss:$0 sm:$0xff]  ;;  %vm195_vm1 = vcmask 64512   ;;  %v144_v31 = vlaneseq }
   0x5   :  { %1658 = vmatpush3.bf16.msra.mxu0 %v1655_v3  ;;  %s1852_s14 = smov 120   ;;  %s1853_s0 = smov 96   ;;  %vm1950_vm2 = vmpackc.low %vm195_vm1, %vm195_vm1  ;;  %v1857_v38 = vmov -1e+30   ;;  %vm279_vm5 = vcmask 130048  }
   0x6   :  { %1660 = vmatprep.subr.bf16.mxu0 %v1659_v6  ;;  %s1854_s2 = smov 88   ;;  %s1855_s15 = smov 112   ;;  %v145_v32 = vshrl.u32 %v144_v31, 7  ;;  %v172_v34 = vand.u32 127, %v144_v31 }
   0x7   :  { %s1856_s16 = smov 80   ;;  %s1858_s17 = smov 56  }
   0x8   :  { %v146_v33 = vadd.s32 8, %v145_v32  ;;  %v177_v36 = vand.u32 1, %v172_v34  ;;  %v151_v37 = vand.u32 1, %v145_v32  ;;  %s1859_s18 = smov 72   ;;  %s1860_s19 = smov 64  }
   0x9   :  { %1662 = vmatpush3.bf16.msra.mxu0 %v1659_v6  ;;  %s1861_s20 = smov 104   ;;  %s1862_s21 = smov 48  }
   0xa   :  { %v158_v35 = vand.u32 1, %v146_v33  ;;  %vm185_vm4 = vcmp.eq.s32.totalorder %v151_v37, %v177_v36  ;;  %s1863_s22 = smov 40  }
   0xb   :  { %v1973_v40 = vsel %vm185_vm4, 0.0, %v1857_v38 }
   0xc   :  { %1542 = vmatmul.mubr.msk.f32.vlgmr.msra.gmra.mrb[0].mxu0 %vm62_vm0, %v28_v7  ;;  %vm186_vm3 = vcmp.eq.s32.totalorder %v158_v35, %v177_v36 }
   0xd   :  { %v1971_v39 = vsel %vm186_vm3, 0.0, %v1857_v38 }
  0xdf   :  { %v1543_v9 = vpop.f32.mrb[0].mxu0 }
  0xe0   :  { %v1930_v10 = vadd.f32 %v1543_v9, %v1428_v8  ;;  %v135_v11 = vpop.f32.mrb[1].mxu0 }
  0xe1   :  { %v1932_v12 = vadd.f32 %v1428_v8, %v135_v11 }
  0xe3   :  { %389 = vrot.lane.b32.xlu1 %v1932_v12, %s1852_s14  ;;  %1548 = vmatprep.mubr.msk.f32.mxu0 %vm195_vm1, %v1932_v12  ;;  %v1939_v13 = vpack.i.bf16 %v1930_v10, %v1932_v12 }
  0xe5   :  { %1757 = vrot.lane.b32.xlu0 %v1939_v13, %s1853_s0 }
  0xe7   :  { %391 = vrot.lane.b32.xlu1 %v1930_v10, %s1852_s14 }
  0xe9   :  { %1762 = vrot.lane.b32.xlu0 %v1939_v13, %s1854_s2 }
  0xeb   :  { %751 = vrot.lane.b32.xlu1 %v1932_v12, %s1855_s15 }
  0xed   :  { %1767 = vrot.lane.b32.xlu0 %v1939_v13, %s1856_s16 }
  0xf1   :  { %753 = vrot.lane.b32.xlu0 %v1930_v10, %s1855_s15 }
 0x155   :  { %v390_v14 = vpop.permute.xlu1 %389 }
 0x156   :  { %1562 = vmatprep.mubr.msk.f32.mxu1 %vm195_vm1, %v390_v14 }
 0x157   :  { %v1758_v15 = vpop.permute.xlu0 %1757 }
 0x158   :  { %v1760_v16 = vunpack.i.h.bf16 %v1758_v15  ;;  %v1759_v17 = vunpack.i.l.bf16 %v1758_v15 }
 0x159   :  { %v392_v27 = vpop.permute.xlu1 %391 }
 0x15a   :  { %v1663_v19 = vpack.c.bf16 %v1760_v16, %v1759_v17 }
 0x15b   :  { %v1763_v20 = vpop.permute.xlu0 %1762 }
 0x15c   :  { %v1765_v21 = vunpack.i.h.bf16 %v1763_v20  ;;  %v1764_v22 = vunpack.i.l.bf16 %v1763_v20  ;;  %1665 = vmatprep.subr.msk.bf16.mxu0 %vm1950_vm2, %v1663_v19 }
 0x15d   :  { %1668 = vmatpush3.bf16.xpose.msk.msra.mxu0 %vm1950_vm2, %v1663_v19  ;;  %v752_v29 = vpop.permute.xlu1 %751 }
 0x15e   :  { %v1673_v23 = vpack.c.bf16 %v1765_v21, %v1764_v22 }
 0x15f   :  { %v1768_v24 = vpop.permute.xlu0 %1767 }
 0x160   :  { %v1770_v25 = vunpack.i.h.bf16 %v1768_v24  ;;  %v1769_v26 = vunpack.i.l.bf16 %v1768_v24  ;;  %1675 = vmatprep.subr.msk.bf16.mxu1 %vm1950_vm2, %v1673_v23 }
 0x161   :  { %1678 = vmatpush3.bf16.xpose.msk.msra.mxu1 %vm1950_vm2, %v1673_v23 }
 0x162   :  { %v1683_v28 = vpack.c.bf16 %v1770_v25, %v1769_v26 }
 0x163   :  { %v754_v30 = vpop.permute.xlu0 %753 }
 0x164   :  { %1549 = vmatmul.mubr.msk.f32.vlgmr.msra.gmra.mrb[2].mxu0 %vm195_vm1, %v1930_v10  ;;  %1685 = vmatprep.subr.msk.bf16.mxu1 %vm1950_vm2, %v1683_v28 }
 0x168   :  { %1563 = vmatmul.mubr.msk.f32.vlgmr.msra.gmra.mrb[0].mxu1 %vm195_vm1, %v392_v27 }
 0x169   :  { %1688 = vmatpush3.bf16.xpose.msk.msra.mxu1 %vm1950_vm2, %v1683_v28  ;;  %1586 = vmatprep.mubr.msk.f32.mxu1 %vm195_vm1, %v752_v29 }
 0x170   :  { %1587 = vmatmul.mubr.msk.f32.vlgmr.msra.gmra.mrb[2].mxu1 %vm195_vm1, %v754_v30 }
 0x237   :  { %v1550_v41 = vpop.f32.mrb[2].mxu0 }
 0x238   :  { %v276_v42 = vadd.f32 %v1550_v41, %v1971_v39  ;;  %v270_v43 = vpop.f32.mrb[3].mxu0 }
 0x239   :  { %v271_v44 = vadd.f32 %v270_v43, %v1973_v40 }
 0x23a   :  { %v283_v45 = vsel %vm279_vm5, %v276_v42, -inf }
 0x23b   :  { %v1564_v46 = vpop.f32.mrb[0].mxu1  ;;  %284 = vmax.xlane.f32.xlu0 %v283_v45  ;;  %v280_v47 = vsel %vm279_vm5, %v271_v44, -inf }
 0x23c   :  { %v477_v48 = vadd.f32 %v1564_v46, %v1971_v39  ;;  %v471_v49 = vpop.f32.mrb[1].mxu1  ;;  %281 = vmax.xlane.f32.xlu1 %v280_v47 }
 0x23d   :  { %v472_v50 = vadd.f32 %v471_v49, %v1973_v40 }
 0x23e   :  { %v483_v51 = vsel %vm279_vm5, %v477_v48, -inf }
 0x23f   :  { %v480_v52 = vsel %vm279_vm5, %v472_v50, -inf }
 0x240   :  { %481 = vmax.xlane.f32.xlu0 %v480_v52  ;;  %484 = vmax.xlane.f32.xlu1 %v483_v51 }
 0x243   :  { %v1588_v53 = vpop.f32.mrb[2].mxu1 }
 0x244   :  { %v833_v54 = vpop.f32.mrb[3].mxu1  ;;  %v839_v16 = vadd.f32 %v1588_v53, %v1971_v39  ;;  %v35_v53 = vld [vmem:[%s2111_s3 + $0x8] sm:$0xff] }
 0x245   :  { %v834_v14 = vadd.f32 %v833_v54, %v1973_v40  ;;  %v34_v54 = vld [vmem:[%s2111_s3] sm:$0xff] }
 0x246   :  { %v845_v17 = vsel %vm279_vm5, %v839_v16, -inf }
 0x247   :  { %v842_v15 = vsel %vm279_vm5, %v834_v14, -inf }
 0x2c8   :  { %v285_v55 = vpop.xlane.xlu0 %284 }
 0x2c9   :  { %v287_v56 = vsub.f32 %v276_v42, %v285_v55  ;;  %v282_v57 = vpop.xlane.xlu1 %281 }
 0x2ca   :  { %v286_v58 = vsub.f32 %v271_v44, %v282_v57 }
 0x2cb   :  { %v290_v59 = vmul.f32 1.442695, %v287_v56 }
 0x2cc   :  { %v288_v60 = vmul.f32 1.442695, %v286_v58 }
 0x2cd   :  { %1796 = vpow2.f32 %v290_v59  ;;  %v482_v61 = vpop.xlane.xlu0 %481  ;;  %v485_v62 = vpop.xlane.xlu1 %484 }
 0x2ce   :  { %1798 = vpow2.f32 %v288_v60  ;;  %v486_v63 = vsub.f32 %v472_v50, %v482_v61  ;;  %v487_v0 = vsub.f32 %v477_v48, %v485_v62 }
 0x2d0   :  { %v488_v1 = vmul.f32 1.442695, %v486_v63  ;;  %v490_v2 = vmul.f32 1.442695, %v487_v0 }
 0x2d2   :  { %1800 = vpow2.f32 %v488_v1 }
 0x2d3   :  { %1802 = vpow2.f32 %v490_v2 }
 0x2d7   :  { %v1797_v3 = vpop.eup %1796 }
 0x2d8   :  { %v1799_v4 = vpop.eup %1798  ;;  %v295_v5 = vsel %vm279_vm5, %v1797_v3, 0.0 }
 0x2d9   :  { %296 = vadd.xlane.f32.xlu1 %v295_v5  ;;  %v292_v6 = vsel %vm279_vm5, %v1799_v4, 0.0 }
 0x2da   :  { %293 = vadd.xlane.f32.xlu0 %v292_v6 }
 0x2dc   :  { %v1801_v7 = vpop.eup %1800 }
 0x2dd   :  { %v1803_v8 = vpop.eup %1802  ;;  %v492_v9 = vsel %vm279_vm5, %v1801_v7, 0.0 }
 0x2de   :  { %493 = vadd.xlane.f32.xlu0 %v492_v9  ;;  %v495_v11 = vsel %vm279_vm5, %v1803_v8, 0.0 }
 0x2df   :  { %496 = vadd.xlane.f32.xlu1 %v495_v11  ;;  %v36_v11 = vld [vmem:[%s2111_s3 + $0x10] sm:$0xff] }
 0x2f0   :  { %1777 = vrot.lane.b32.xlu1 %v1939_v13, %s1858_s17 }
 0x2f4   :  { %1782 = vrot.lane.b32.xlu1 %v1939_v13, %s1859_s18  ;;  %1772 = vrot.lane.b32.xlu0 %v1939_v13, %s1860_s19 }
 0x2f8   :  { %1036 = vrot.lane.b32.xlu1 %v1930_v10, %s1861_s20  ;;  %1034 = vrot.lane.b32.xlu0 %v1932_v12, %s1861_s20 }
 0x317   :  { %843 = vmax.xlane.f32.xlu0 %v842_v15 }
 0x31c   :  { %846 = vmax.xlane.f32.xlu1 %v845_v17 }
 0x32d   :  { %1787 = vrot.lane.b32.xlu1 %v1939_v13, %s1862_s21 }
 0x331   :  { %1792 = vrot.lane.b32.xlu1 %v1939_v13, %s1863_s22 }
 0x366   :  { %v297_v19 = vpop.xlane.xlu1 %296 }
 0x367   :  { %v294_v10 = vpop.xlane.xlu0 %293 }
 0x368   :  { %1804 = vrcp.f32 %v294_v10 }
 0x369   :  { %1806 = vrcp.f32 %v297_v19 }
 0x36b   :  { %v494_v12 = vpop.xlane.xlu0 %493 }
 0x36c   :  { %1808 = vrcp.f32 %v494_v12  ;;  %v497_v20 = vpop.xlane.xlu1 %496 }
 0x36d   :  { %1810 = vrcp.f32 %v497_v20 }
 0x36f   :  { %v1773_v21 = vpop.permute.xlu0 %1772 }
 0x370   :  { %v1775_v22 = vunpack.i.h.bf16 %v1773_v21  ;;  %v1774_v23 = vunpack.i.l.bf16 %v1773_v21  ;;  %v1778_v24 = vpop.permute.xlu1 %1777 }
 0x371   :  { %v1780_v25 = vunpack.i.h.bf16 %v1778_v24  ;;  %v1779_v26 = vunpack.i.l.bf16 %v1778_v24 }
 0x372   :  { %v1805_v27 = vpop.eup %1804  ;;  %v1669_v28 = vpack.c.bf16 %v1775_v22, %v1774_v23 }
 0x373   :  { %v1807_v29 = vpop.eup %1806  ;;  %v1035_v30 = vpop.permute.xlu0 %1034  ;;  %v300_v31 = vmul.f32 %v1805_v27, %v1799_v4  ;;  %v1679_v13 = vpack.c.bf16 %v1780_v25, %v1779_v26 }
 0x374   :  { %v1783_v32 = vpop.permute.xlu1 %1782  ;;  %1670 = vmatprep.subr.bf16.mxu0 %v1669_v28  ;;  %1605 = vmatprep.mubr.msk.f32.mxu1 %vm195_vm1, %v1035_v30  ;;  %v301_v36 = vmul.f32 %v1807_v29, %v1797_v3 }
 0x375   :  { %v1785_v33 = vunpack.i.h.bf16 %v1783_v32  ;;  %v1784_v34 = vunpack.i.l.bf16 %v1783_v32  ;;  %1672 = vmatpush3.bf16.msra.mxu0 %v1669_v28  ;;  %1555 = vmatprep.mubr.msk.f32.mxu0 %vm279_vm5, %v300_v31  ;;  %v37_v28 = vld [vmem:[%s2111_s3 + $0x18] sm:$0xff] }
 0x376   :  { %v1809_v35 = vpop.eup %1808  ;;  %1680 = vmatprep.subr.bf16.mxu0 %v1679_v13 }
 0x377   :  { %v1811_v37 = vpop.eup %1810  ;;  %v1693_v38 = vpack.c.bf16 %v1785_v33, %v1784_v34  ;;  %v500_v41 = vmul.f32 %v1809_v35, %v1801_v7  ;;  %v39_v34 = vld [vmem:[%s2113_s5] sm:$0xff]  ;;  %v40_v35 = vld [vmem:[%s2113_s5 + $0x8] sm:$0xff] }
 0x378   :  { %1556 = vmatmul.mubr.msk.f32.vlgmr.msra.gmra.mrb[4].mxu0 %vm279_vm5, %v301_v36  ;;  %v501_v42 = vmul.f32 %v1811_v37, %v1803_v8  ;;  %v1037_v43 = vpop.permute.xlu1 %1036  ;;  %v41_v36 = vld [vmem:[%s2113_s5 + $0x10] sm:$0xff]  ;;  %v1703_v37 = vpack.c.bf16 %v40_v35, %v39_v34 }
 0x379   :  { %1695 = vmatprep.subr.msk.bf16.mxu1 %vm1950_vm2, %v1693_v38  ;;  %1682 = vmatpush3.bf16.msra.mxu0 %v1679_v13 }
 0x37a   :  { %1569 = vmatprep.mubr.msk.f32.mxu0 %vm279_vm5, %v500_v41  ;;  %1698 = vmatpush3.bf16.xpose.msk.msra.mxu1 %vm1950_vm2, %v1693_v38  ;;  %v42_v38 = vld [vmem:[%s2113_s5 + $0x18] sm:$0xff] }
 0x37b   :  { %1572 = vmatprep.subr.mxu0 %v35_v53  ;;  %v1707_v41 = vpack.c.bf16 %v42_v38, %v41_v36  ;;  %1704 = vmatprep.subr.bf16.mxu1 %v1703_v37 }
 0x37c   :  { %1570 = vmatmul.mubr.msk.f32.vlgmr.msra.gmra.mrb[6].mxu0 %vm279_vm5, %v501_v42  ;;  %v43_v42 = vld [vmem:[%s2113_s5 + $0x20] sm:$0xff] }
 0x37d   :  { %1573 = vmatpush3.msra.mxu0 %v35_v53  ;;  %v51_v53 = vld [vmem:[%s2113_s5 + $0x60] sm:$0xff] }
 0x37e   :  { %1577 = vmatprep.subr.mxu0 %v34_v54 }
 0x381   :  { %1606 = vmatmul.mubr.msk.f32.vlgmr.msra.gmra.mrb[4].mxu1 %vm195_vm1, %v1037_v43  ;;  %v44_v43 = vld [vmem:[%s2113_s5 + $0x28] sm:$0xff] }
 0x382   :  { %1706 = vmatpush3.bf16.msra.mxu1 %v1703_v37 }
 0x383   :  { %1708 = vmatprep.subr.bf16.mxu1 %v1707_v41 }
 0x386   :  { %1710 = vmatpush3.bf16.msra.mxu1 %v1707_v41 }
 0x3a4   :  { %v844_v44 = vpop.xlane.xlu0 %843 }
 0x3a5   :  { %v848_v45 = vsub.f32 %v834_v14, %v844_v44  ;;  %v1711_v44 = vpack.c.bf16 %v44_v43, %v43_v42 }
 0x3a7   :  { %v850_v46 = vmul.f32 1.442695, %v848_v45  ;;  %v45_v45 = vld [vmem:[%s2113_s5 + $0x30] sm:$0xff]  ;;  %1712 = vmatprep.subr.bf16.mxu1 %v1711_v44 }
 0x3a8   :  { %1714 = vmatpush3.bf16.msra.mxu1 %v1711_v44 }
 0x3a9   :  { %1812 = vpow2.f32 %v850_v46  ;;  %v847_v47 = vpop.xlane.xlu1 %846  ;;  %v46_v46 = vld [vmem:[%s2113_s5 + $0x38] sm:$0xff] }
 0x3aa   :  { %v849_v48 = vsub.f32 %v839_v16, %v847_v47  ;;  %v1715_v47 = vpack.c.bf16 %v46_v46, %v45_v45 }
 0x3ac   :  { %v852_v49 = vmul.f32 1.442695, %v849_v48  ;;  %v47_v48 = vld [vmem:[%s2113_s5 + $0x40] sm:$0xff]  ;;  %1716 = vmatprep.subr.bf16.mxu1 %v1715_v47 }
 0x3ad   :  { %v1788_v56 = vpop.permute.xlu1 %1787  ;;  %1718 = vmatpush3.bf16.msra.mxu1 %v1715_v47 }
 0x3ae   :  { %1814 = vpow2.f32 %v852_v49  ;;  %v1790_v60 = vunpack.i.h.bf16 %v1788_v56  ;;  %v1789_v61 = vunpack.i.l.bf16 %v1788_v56  ;;  %v48_v49 = vld [vmem:[%s2113_s5 + $0x48] sm:$0xff] }
 0x3b0   :  { %v1689_v0 = vpack.c.bf16 %v1790_v60, %v1789_v61  ;;  %v1463_v61 = vld [vmem:[%s2112_s4] ss:$0 sm:$0xff] }
 0x3b1   :  { %v1793_v5 = vpop.permute.xlu1 %1792 }
 0x3b2   :  { %v1795_v14 = vunpack.i.h.bf16 %v1793_v5  ;;  %v1794_v15 = vunpack.i.l.bf16 %v1793_v5 }
 0x3b3   :  { %v1813_v50 = vpop.eup %1812 }
 0x3b4   :  { %v854_v51 = vsel %vm279_vm5, %v1813_v50, 0.0 }
 0x3b5   :  { %855 = vadd.xlane.f32.xlu0 %v854_v51  ;;  %v49_v51 = vld [vmem:[%s2113_s5 + $0x50] sm:$0xff] }
 0x3b8   :  { %v1815_v52 = vpop.eup %1814 }
 0x3b9   :  { %v857_v18 = vsel %vm279_vm5, %v1815_v52, 0.0 }
 0x3ba   :  { %858 = vadd.xlane.f32.xlu0 %v857_v18 }
 0x442   :  { %v856_v55 = vpop.xlane.xlu0 %855 }
 0x443   :  { %1816 = vrcp.f32 %v856_v55 }
 0x447   :  { %v859_v58 = vpop.xlane.xlu0 %858 }
 0x448   :  { %1818 = vrcp.f32 %v859_v58  ;;  %v53_v58 = vld [vmem:[%s2113_s5 + $0x70] sm:$0xff] }
 0x44b   :  { %v1557_v57 = vpop.f32.mrb[4].mxu0 }
 0x44c   :  { %v380_v59 = vpop.f32.mrb[5].mxu0 }
 0x44d   :  { %v1817_v3 = vpop.eup %1816 }
 0x44e   :  { %v862_v9 = vmul.f32 %v1817_v3, %v1813_v50  ;;  %v1719_v50 = vpack.c.bf16 %v48_v49, %v47_v48 }
 0x44f   :  { %v1571_v62 = vpop.f32.mrb[6].mxu0 }
 0x450   :  { %v580_v63 = vpop.f32.mrb[7].mxu0  ;;  %1720 = vmatprep.subr.bf16.mxu1 %v1719_v50 }
 0x451   :  { %1574 = vmatprep.mubr.msk.f32.mxu0 %vm195_vm1, %v580_v63  ;;  %1722 = vmatpush3.bf16.msra.mxu1 %v1719_v50 }
 0x452   :  { %1575 = vmatmul.mubr.msk.f32.vlgmr.msra.gmra.mrb[8].mxu0 %vm195_vm1, %v1571_v62  ;;  %v1819_v8 = vpop.eup %1818 }
 0x453   :  { %1578 = vmatpush3.msra.mxu0 %v34_v54  ;;  %1579 = vmatprep.mubr.msk.f32.mxu0 %vm195_vm1, %v380_v59  ;;  %v52_v54 = vld [vmem:[%s2113_s5 + $0x68] sm:$0xff]  ;;  %v54_v59 = vld [vmem:[%s2113_s5 + $0x78] sm:$0xff] }
 0x454   :  { %1690 = vmatprep.subr.bf16.mxu0 %v1689_v0  ;;  %v1607_v1 = vpop.f32.mrb[4].mxu1  ;;  %v1727_v55 = vpack.c.bf16 %v52_v54, %v51_v53  ;;  %v1731_v60 = vpack.c.bf16 %v54_v59, %v53_v58 }
 0x455   :  { %v1116_v2 = vpop.f32.mrb[5].mxu1  ;;  %v1122_v6 = vadd.f32 %v1607_v1, %v1971_v39  ;;  %v1699_v39 = vpack.c.bf16 %v1795_v14, %v1794_v15 }
 0x456   :  { %v1117_v4 = vadd.f32 %v1116_v2, %v1973_v40  ;;  %v863_v40 = vmul.f32 %v1819_v8, %v1815_v52  ;;  %v50_v52 = vld [vmem:[%s2113_s5 + $0x58] sm:$0xff]  ;;  %s1864_s5 = smov [#allocation2]  }
 0x457   :  { %v1128_v16 = vsel %vm279_vm5, %v1122_v6, -inf  ;;  %v1723_v18 = vpack.c.bf16 %v50_v52, %v49_v51  ;;  %s1417_s0 = sshll.u32 %s1864_s5, 4  ;;  %s1418_s0 = int_to_ptr.vmem [resolvable:$true] %s1417_s0 }
 0x458   :  { %v1125_v7 = vsel %vm279_vm5, %v1117_v4, -inf  ;;  %s1828_s4 = scalar_lea.vmem %s1418_s0, 256  ;;  %p1833_p1 = scmp.lt.s32.totalorder %s1418_s0, %s1418_s0 }
 0x459   :  { %1126 = vmax.xlane.f32.xlu0 %v1125_v7  ;;  %1724 = vmatprep.subr.bf16.mxu1 %v1723_v18  ;;  %p1829_p0 = scmp.ne.s32.totalorder %s1418_s0, %s1828_s4  ;;  %p1834_p2 = scmp.lt.s32.totalorder %s1828_s4, %s1828_s4 }
 0x45a   :  { %1580 = vmatmul.mubr.msk.f32.vlgmr.msra.gmra.mrb[8].mxu0 %vm195_vm1, %v1557_v57  ;;  %1726 = vmatpush3.bf16.msra.mxu1 %v1723_v18 }
 0x45b   :  { %1692 = vmatpush3.bf16.msra.mxu0 %v1689_v0  ;;  %1593 = vmatprep.mubr.msk.f32.mxu0 %vm279_vm5, %v862_v9  ;;  %p1835_p3 = por %p1834_p2, %p1833_p1 }
 0x45c   :  { %1596 = vmatprep.subr.mxu0 %v36_v11  ;;  %1728 = vmatprep.subr.bf16.mxu1 %v1727_v55 }
 0x45d   :  { %1129 = vmax.xlane.f32.xlu0 %v1128_v16  ;;  %p1836_p4 = pnand %p1835_p3, %p1829_p0 }
 0x45e   :  { %1594 = vmatmul.mubr.msk.f32.vlgmr.msra.gmra.mrb[10].mxu0 %vm279_vm5, %v863_v40  ;;  %1730 = vmatpush3.bf16.msra.mxu1 %v1727_v55 }
 0x45f   :  { %1597 = vmatpush3.msra.mxu0 %v36_v11  ;;  %1732 = vmatprep.subr.bf16.mxu1 %v1731_v60 }
 0x460   :  { %1700 = vmatprep.subr.bf16.mxu0 %v1699_v39 }
 0x462   :  { %1734 = vmatpush3.bf16.msra.mxu1 %v1731_v60 }
 0x4e6   :  { %v1127_v17 = vpop.xlane.xlu0 %1126 }
 0x4e7   :  { %v1131_v19 = vsub.f32 %v1117_v4, %v1127_v17  ;;  %v1464_v4 = vld [vmem:[%s2114_s6] ss:$0 sm:$0xff] }
 0x4e9   :  { %v1133_v10 = vmul.f32 1.442695, %v1131_v19 }
 0x4ea   :  { %v1130_v12 = vpop.xlane.xlu0 %1129 }
 0x4eb   :  { %1820 = vpow2.f32 %v1133_v10  ;;  %v1132_v20 = vsub.f32 %v1122_v6, %v1130_v12 }
 0x4ed   :  { %v1135_v21 = vmul.f32 1.442695, %v1132_v20 }
 0x4ef   :  { %1822 = vpow2.f32 %v1135_v21 }
 0x4f5   :  { %v1821_v22 = vpop.eup %1820 }
 0x4f6   :  { %v1137_v23 = vsel %vm279_vm5, %v1821_v22, 0.0 }
 0x4f7   :  { %1138 = vadd.xlane.f32.xlu0 %v1137_v23 }
 0x4f9   :  { %v1823_v24 = vpop.eup %1822 }
 0x4fa   :  { %v1140_v25 = vsel %vm279_vm5, %v1823_v24, 0.0 }
 0x4fb   :  { %1141 = vadd.xlane.f32.xlu0 %v1140_v25 }
 0x531   :  { %v1595_v26 = vpop.f32.mrb[10].mxu0 }
 0x532   :  { %v942_v27 = vpop.f32.mrb[11].mxu0 }
 0x533   :  { %1598 = vmatprep.mubr.msk.f32.mxu0 %vm195_vm1, %v942_v27 }
 0x534   :  { %1599 = vmatmul.mubr.msk.f32.vlgmr.msra.gmra.mrb[8].mxu0 %vm195_vm1, %v1595_v26 }
 0x535   :  { %1702 = vmatpush3.bf16.msra.mxu0 %v1699_v39 }
 0x536   :  { %1615 = vmatprep.subr.mxu0 %v37_v28 }
 0x584   :  { %v1139_v29 = vpop.xlane.xlu0 %1138 }
 0x585   :  { %1824 = vrcp.f32 %v1139_v29 }
 0x588   :  { %v1142_v30 = vpop.xlane.xlu0 %1141 }
 0x589   :  { %1826 = vrcp.f32 %v1142_v30 }
 0x58f   :  { %v1825_v31 = vpop.eup %1824 }
 0x590   :  { %v1145_v13 = vmul.f32 %v1825_v31, %v1821_v22 }
 0x592   :  { %1612 = vmatprep.mubr.msk.f32.mxu0 %vm279_vm5, %v1145_v13 }
 0x593   :  { %v1827_v32 = vpop.eup %1826 }
 0x594   :  { %v1146_v33 = vmul.f32 %v1827_v32, %v1823_v24 }
 0x596   :  { %1613 = vmatmul.mubr.msk.f32.vlgmr.msra.gmra.mrb[12].mxu0 %vm279_vm5, %v1146_v33 }
 0x597   :  { %1616 = vmatpush3.msra.mxu0 %v37_v28 }
 0x669   :  { %v1614_v56 = vpop.f32.mrb[12].mxu0 }
 0x66a   :  { %v1225_v57 = vpop.f32.mrb[13].mxu0 }
 0x66b   :  { %1617 = vmatprep.mubr.msk.f32.mxu0 %vm195_vm1, %v1225_v57 }
 0x66c   :  { %1618 = vmatmul.mubr.msk.f32.vlgmr.msra.gmra.mrb[8].mxu0 %vm195_vm1, %v1614_v56 }
 0x73f   :  { %v1619_v62 = vpop.f32.mrb[8].mxu0 }
 0x740   :  { %v1324_v63 = vadd.f32 %v1619_v62, %v1463_v61  ;;  %v1306_v0 = vpop.f32.mrb[9].mxu0 }
 0x741   :  { %v1323_v1 = vadd.f32 %v1463_v61, %v1306_v0 }
 0x742   :  { %v1326_v3 = vmax.f32 %v1324_v63, 0.0 }
 0x743   :  { %v1325_v2 = vmax.f32 %v1323_v1, 0.0 }
 0x745   :  { %1652 = vmatprep.mubr.f32.mxu1 %v1325_v2 }
 0x746   :  { %1653 = vmatmul.mubr.f32.vlgmr.msra.gmra.mrb[6].mxu1 %v1326_v3 }
 0x819   :  { %v1654_v5 = vpop.f32.mrb[6].mxu1 }
 0x81a   :  { %v1405_v6 = vadd.f32 %v1654_v5, %v1464_v4  ;;  %v1399_v7 = vpop.f32.mrb[7].mxu1 }
 0x81b   :  { %v1400_v8 = vadd.f32 %v1464_v4, %v1399_v7 }
 0x81c   :  { %v1409_v9 = vmax.f32 %v1405_v6, 0.0 }
 0x81d   :  { %v1408_v11 = vmax.f32 %v1400_v8, 0.0 }
 0x81e   :  { %1411 = vst.msk [vmem:[#allocation2 + $0x8] sm:$0xff] %vm62_vm0, %v1409_v9 }
 0x81f   :  { %1410 = vst.msk [vmem:[#allocation2] sm:$0xff] %vm62_vm0, %v1408_v11 }
 0x820   :  { %1839 = shalt.err (!%p1836_p4)
}
 0x821   :  { %s1840_s15 = scalar_lea.hbm %s2115_s7, 256 }
 0x822   :  { %p1841_p5 = scmp.ne.s32.totalorder %s2115_s7, %s1840_s15  ;;  %p1844_p6 = scmp.lt.u32.totalorder %s1840_s15, %s2115_s7 }
 0x824   :  { %p1846_p7 = pnand %p1844_p6, %p1841_p5 }
 0x826   :  { %1849 = shalt.err (!%p1846_p7)
}
 0x827   :  { %s1865_s20 = smov 128   ;;  %s1866_s21 = smov 8  }
 0x828   :  { %1423 = dma.vmem_to_hbm [thread:$0]  %s1418_s0, 256, %s2115_s7, [#allocation3], %s1865_s20, %s1865_s20, %s1866_s21  }
 0x829   :  { %1850 = dma.done.wait [#allocation3], 256  }
 0x82a   :  { %1851 = vsyncadd [#allocation3], 4294967040 }
 0x82b   :  { %1427 = vsyncpa [#allocation3], 1 }

</bundles_post_ra>
